<compile_context>
chip_gen: v7x
topology: tpu7x:2x2x1
jax: 0.10.0
libtpu: 0.0.40
codegen_flags: <defaults>
</compile_context>

<pallas_src>
import functools
import math

import jax
import jax.numpy as jnp
from jax import lax
from jax.experimental import pallas as pl
from jax.experimental.pallas import tpu as pltpu

_ZERO_MASK = -1e30   # module semantics: scores[scores == 0] = -1e30
_NEG_BIG = -1e37     # finite pad-mask / running-max init (avoids exp(-inf - -inf) NaN)


def _flash_attn_kernel(q_ref, k_ref, v_ref, o_ref, m_sc, l_sc, acc_sc,
                       *, scale, k_actual, block_k):
    # q_ref: (bb, tq, D)  k_ref: (bb, tk, D)  v_ref: (bb, tk, Dv)
    # o_ref: (bb, tq, Dv) scratch: m/l (bb, tq, 1), acc (bb, tq, Dv)  (f32)
    ki = pl.program_id(2)

    @pl.when(ki == 0)
    def _init():
        m_sc[...] = jnp.full_like(m_sc, _NEG_BIG)
        l_sc[...] = jnp.zeros_like(l_sc)
        acc_sc[...] = jnp.zeros_like(acc_sc)

    q = q_ref[...]
    k = k_ref[...]
    v = v_ref[...]

    # scores = q @ k^T / sqrt(d): contract last dims directly (no transpose),
    # batch over the bb dim, f32 accumulation on the MXU.
    s = lax.dot_general(
        q, k,
        dimension_numbers=(((2,), (2,)), ((0,), (0,))),
        preferred_element_type=jnp.float32) * jnp.float32(scale)     # (bb, tq, tk)

    # Module semantics: scores that are exactly zero are masked out.
    s = jnp.where(s == 0.0, jnp.float32(_ZERO_MASK), s)

    # Mask key positions that are zero-padding added by the wrapper.
    col = ki * block_k + lax.broadcasted_iota(jnp.int32, s.shape, 2)
    s = jnp.where(col < k_actual, s, jnp.float32(_NEG_BIG))

    # Online softmax accumulation.
    m_prev = m_sc[...]                                               # (bb, tq, 1)
    m_new = jnp.maximum(m_prev, jnp.max(s, axis=-1, keepdims=True))
    alpha = jnp.exp(m_prev - m_new)
    p = jnp.exp(s - m_new)                                           # (bb, tq, tk)
    l_sc[...] = alpha * l_sc[...] + jnp.sum(p, axis=-1, keepdims=True)
    acc_sc[...] = alpha * acc_sc[...] + lax.dot_general(
        p.astype(v.dtype), v,
        dimension_numbers=(((2,), (1,)), ((0,), (0,))),
        preferred_element_type=jnp.float32)
    m_sc[...] = m_new

    @pl.when(ki == pl.num_programs(2) - 1)
    def _finalize():
        l = l_sc[...]
        inv = pl.reciprocal(l, approx=True)        # EUP vrcp (own VLIW slot)
        inv = inv * (2.0 - l * inv)                # one Newton step -> ~f32 accuracy
        o_ref[...] = (acc_sc[...] * inv).astype(o_ref.dtype)


def _round_up(x, m):
    return ((x + m - 1) // m) * m


def dot_product_attention(queries, keys, values, dropout=0.0, *,
                          block_q=256, block_k=512):
    """queries: (B, Q, D), keys: (B, K, D), values: (B, K, Dv) -> (B, Q, Dv).

    block_q / block_k defaults (256 / 512) fit comfortably in a 32 MiB scoped
    VMEM budget on v5e/v6e/v7x; v6e/v5e users can raise block_k for longer MXU
    cadence per softmax epilogue.
    """
    del dropout  # eval-mode nn.Dropout is identity; TODO(synk): training dropout
    B, Q, D = queries.shape
    Bk, K, Dk = keys.shape
    Bv, Kv, Dv = values.shape
    assert B == Bk == Bv and D == Dk and K == Kv

    scale = 1.0 / math.sqrt(D)

    # Tile sizes (sublane-align Q, lane-align K) and lane-dense padding of
    # the feature dims so stores are unmasked vst and MXU lanes are filled.
    tq = min(block_q, _round_up(Q, 8))
    tk = min(block_k, _round_up(K, 128))
    d_pad = _round_up(D, 128)
    dv_pad = _round_up(Dv, 128)
    q_pad = _round_up(Q, tq)
    k_pad = _round_up(K, tk)

    # Fold the whole batch into one block when it is small (amortizes the
    # ~0.35us/grid-step overhead on tiny problems); otherwise one batch/step.
    per_batch_bytes = 4 * (2 * tq * d_pad + 2 * tk * d_pad + 2 * tk * dv_pad
                           + 3 * tq * dv_pad + tq * tk)
    bb = B if B * per_batch_bytes <= 8 * 1024 * 1024 else 1

    q_p = jnp.pad(queries, ((0, 0), (0, q_pad - Q), (0, d_pad - D)))
    k_p = jnp.pad(keys, ((0, 0), (0, k_pad - K), (0, d_pad - D)))
    v_p = jnp.pad(values, ((0, 0), (0, k_pad - K), (0, dv_pad - Dv)))

    kernel = functools.partial(_flash_attn_kernel, scale=scale,
                               k_actual=K, block_k=tk)

    grid = (B // bb, q_pad // tq, k_pad // tk)

    grid_spec = pltpu.PrefetchScalarGridSpec(
        num_scalar_prefetch=0,
        grid=grid,
        in_specs=[
            pl.BlockSpec((bb, tq, d_pad), lambda b, qi, ki: (b, qi, 0)),
            pl.BlockSpec((bb, tk, d_pad), lambda b, qi, ki: (b, ki, 0)),
            pl.BlockSpec((bb, tk, dv_pad), lambda b, qi, ki: (b, ki, 0)),
        ],
        out_specs=pl.BlockSpec((bb, tq, dv_pad), lambda b, qi, ki: (b, qi, 0)),
        scratch_shapes=[
            pltpu.VMEM((bb, tq, 1), jnp.float32),       # running max m
            pltpu.VMEM((bb, tq, 1), jnp.float32),       # running denom l
            pltpu.VMEM((bb, tq, dv_pad), jnp.float32),  # running accumulator
        ],
    )

    out_padded = pl.pallas_call(
        kernel,
        out_shape=jax.ShapeDtypeStruct((B, q_pad, dv_pad), queries.dtype),
        grid_spec=grid_spec,
        compiler_params=pltpu.CompilerParams(
            dimension_semantics=("parallel", "parallel", "arbitrary"),
            vmem_limit_bytes=32 * 1024 * 1024,
        ),
    )(q_p, k_p, v_p)

    return out_padded[:, :Q, :Dv]


def _reference(queries, keys, values):
    d = queries.shape[-1]
    scores = jnp.einsum("bqd,bkd->bqk", queries, keys) / math.sqrt(d)
    scores = jnp.where(scores == 0.0, -1e30, scores)
    weights = jax.nn.softmax(scores, axis=-1)
    return jnp.einsum("bqk,bkv->bqv", weights, values)


if __name__ == "__main__":
    key = jax.random.PRNGKey(0)

    # --- test 1: module-scale shapes ------------------------------------
    k1, k2, k3 = jax.random.split(key, 3)
    B, Q, K, D, Dv = 2, 8, 8, 32, 32
    queries = jax.random.normal(k1, (B, Q, D), dtype=jnp.float32)
    keys = jax.random.normal(k2, (B, K, D), dtype=jnp.float32)
    values = jax.random.normal(k3, (B, K, Dv), dtype=jnp.float32)

    out = dot_product_attention(queries, keys, values, dropout=0.0)
    out = jax.block_until_ready(out)
    ref = _reference(queries, keys, values)
    assert out.shape == (B, Q, Dv)
    assert jnp.allclose(out, ref, atol=2e-3, rtol=2e-3), "mismatch vs reference (small)"

    # --- test 2: unaligned shapes exercising Q/K tiling + padding --------
    k4, k5, k6 = jax.random.split(jax.random.PRNGKey(1), 3)
    B2, Q2, K2, D2, Dv2 = 4, 300, 600, 64, 64
    q2 = jax.random.normal(k4, (B2, Q2, D2), dtype=jnp.float32)
    kk2 = jax.random.normal(k5, (B2, K2, D2), dtype=jnp.float32)
    v2 = jax.random.normal(k6, (B2, K2, Dv2), dtype=jnp.float32)

    out2 = dot_product_attention(q2, kk2, v2, dropout=0.0)
    out2 = jax.block_until_ready(out2)
    ref2 = _reference(q2, kk2, v2)
    assert out2.shape == (B2, Q2, Dv2)
    assert jnp.allclose(out2, ref2, atol=2e-3, rtol=2e-3), "mismatch vs reference (tiled)"

    print("KERNEL_OK")
</pallas_src>

<mosaic_0001>
module attributes {stable_mosaic.version = 11 : i64} {
  func.func @_flash_attn_kernel(%arg0: i32, %arg1: i32, %arg2: i32, %arg3: memref<2x8x128xf32, #tpu.memory_space<vmem>>, %arg4: memref<2x128x128xf32, #tpu.memory_space<vmem>>, %arg5: memref<2x128x128xf32, #tpu.memory_space<vmem>>, %arg6: memref<2x8x128xf32, #tpu.memory_space<vmem>>, %arg7: memref<2x8x1xf32, #tpu.memory_space<vmem>>, %arg8: memref<2x8x1xf32, #tpu.memory_space<vmem>>, %arg9: memref<2x8x128xf32, #tpu.memory_space<vmem>>) attributes {dimension_semantics = [#tpu.dimension_semantics<parallel>, #tpu.dimension_semantics<parallel>, #tpu.dimension_semantics<arbitrary>], iteration_bounds = array<i64: 1, 1, 1>, scalar_prefetch = 0 : i64, scratch_operands = 3 : i64, tpu.core_type = #tpu.core_type<tc>, window_params = [{transform_indices = @transform_0, window_bounds = array<i64: 2, 8, 128>}, {transform_indices = @transform_1, window_bounds = array<i64: 2, 128, 128>}, {transform_indices = @transform_2, window_bounds = array<i64: 2, 128, 128>}, {transform_indices = @transform_3, window_bounds = array<i64: 2, 8, 128>}]} {
    %c0_i32 = arith.constant 0 : i32
    %0 = arith.cmpi eq, %arg2, %c0_i32 : i32
    %1 = arith.extui %0 : i1 to i32
    %c0_i32_0 = arith.constant 0 : i32
    %2 = arith.cmpi ne, %1, %c0_i32_0 : i32
    scf.if %2 {
      %cst_36 = arith.constant -9.99999993E+36 : f32
      %46 = vector.broadcast %cst_36 : f32 to vector<2x8x1xf32>
      %c0_37 = arith.constant 0 : index
      %c0_38 = arith.constant 0 : index
      %c0_39 = arith.constant 0 : index
      %47 = vector.load %arg7[%c0_37, %c0_38, %c0_39] : memref<2x8x1xf32, #tpu.memory_space<vmem>>, vector<2x8x1xf32>
      tpu.vector_store %arg7[%c0_37, %c0_38, %c0_39], %46 {strides = array<i32>} : memref<2x8x1xf32, #tpu.memory_space<vmem>>, vector<2x8x1xf32>,
      %cst_40 = arith.constant 0.000000e+00 : f32
      %48 = vector.broadcast %cst_40 : f32 to vector<2x8x1xf32>
      %c0_41 = arith.constant 0 : index
      %c0_42 = arith.constant 0 : index
      %c0_43 = arith.constant 0 : index
      %49 = vector.load %arg8[%c0_41, %c0_42, %c0_43] : memref<2x8x1xf32, #tpu.memory_space<vmem>>, vector<2x8x1xf32>
      tpu.vector_store %arg8[%c0_41, %c0_42, %c0_43], %48 {strides = array<i32>} : memref<2x8x1xf32, #tpu.memory_space<vmem>>, vector<2x8x1xf32>,
      %cst_44 = arith.constant 0.000000e+00 : f32
      %50 = vector.broadcast %cst_44 : f32 to vector<2x8x128xf32>
      %c0_45 = arith.constant 0 : index
      %c0_46 = arith.constant 0 : index
      %c0_47 = arith.constant 0 : index
      %51 = vector.load %arg9[%c0_45, %c0_46, %c0_47] : memref<2x8x128xf32, #tpu.memory_space<vmem>>, vector<2x8x128xf32>
      tpu.vector_store %arg9[%c0_45, %c0_46, %c0_47], %50 {strides = array<i32>} : memref<2x8x128xf32, #tpu.memory_space<vmem>>, vector<2x8x128xf32>,
    } else {
    }
    %c0 = arith.constant 0 : index
    %c0_1 = arith.constant 0 : index
    %c0_2 = arith.constant 0 : index
    %3 = vector.load %arg3[%c0, %c0_1, %c0_2] : memref<2x8x128xf32, #tpu.memory_space<vmem>>, vector<2x8x128xf32>
    %c0_3 = arith.constant 0 : index
    %c0_4 = arith.constant 0 : index
    %c0_5 = arith.constant 0 : index
    %4 = vector.load %arg4[%c0_3, %c0_4, %c0_5] : memref<2x128x128xf32, #tpu.memory_space<vmem>>, vector<2x128x128xf32>
    %c0_6 = arith.constant 0 : index
    %c0_7 = arith.constant 0 : index
    %c0_8 = arith.constant 0 : index
    %5 = vector.load %arg5[%c0_6, %c0_7, %c0_8] : memref<2x128x128xf32, #tpu.memory_space<vmem>>, vector<2x128x128xf32>
    %cst = arith.constant dense<0.000000e+00> : vector<2x8x128xf32>
    %6 = tpu.matmul %3, %4, %cst {dimension_numbers = #tpu.dot_dimension_numbers<[2], [2], [1], [1], [0, 0, 0, 1, 1, 1], [0], [0]>} : vector<2x8x128xf32>, vector<2x128x128xf32>, vector<2x8x128xf32> -> vector<2x8x128xf32>
    %cst_9 = arith.constant 0.176776692 : f32
    %7 = vector.broadcast %cst_9 : f32 to vector<2x8x128xf32>
    %8 = arith.mulf %6, %7 : vector<2x8x128xf32>
    %cst_10 = arith.constant 0.000000e+00 : f32
    %9 = vector.broadcast %cst_10 : f32 to vector<2x8x128xf32>
    %10 = arith.cmpf oeq, %8, %9 : vector<2x8x128xf32>
    %cst_11 = arith.constant -1.000000e+30 : f32
    %11 = vector.broadcast %cst_11 : f32 to vector<2x8x128xf32>
    %12 = arith.select %10, %11, %8 : vector<2x8x128xi1>, vector<2x8x128xf32>
    %c128_i32 = arith.constant 128 : i32
    %13 = arith.muli %arg2, %c128_i32 : i32
    %14 = tpu.iota {dimensions = array<i32: 2>} : vector<2x8x128xi32>
    %15 = vector.broadcast %13 : i32 to vector<2x8x128xi32>
    %16 = arith.addi %15, %14 : vector<2x8x128xi32>
    %c8_i32 = arith.constant 8 : i32
    %17 = vector.broadcast %c8_i32 : i32 to vector<2x8x128xi32>
    %18 = arith.cmpi slt, %16, %17 : vector<2x8x128xi32>
    %cst_12 = arith.constant -9.99999993E+36 : f32
    %19 = vector.broadcast %cst_12 : f32 to vector<2x8x128xf32>
    %20 = arith.select %18, %12, %19 : vector<2x8x128xi1>, vector<2x8x128xf32>
    %c0_13 = arith.constant 0 : index
    %c0_14 = arith.constant 0 : index
    %c0_15 = arith.constant 0 : index
    %21 = vector.load %arg7[%c0_13, %c0_14, %c0_15] : memref<2x8x1xf32, #tpu.memory_space<vmem>>, vector<2x8x1xf32>
    %cst_16 = arith.constant dense<0xFF800000> : vector<2x8xf32>
    %22 = vector.multi_reduction <maximumf>, %20, %cst_16 [2] : vector<2x8x128xf32> to vector<2x8xf32>
    %23 = vector.shape_cast %22 : vector<2x8xf32> to vector<2x8x1xf32>
    %24 = arith.maximumf %21, %23 : vector<2x8x1xf32>
    %25 = arith.subf %21, %24 : vector<2x8x1xf32>
    %26 = math.exp %25 : vector<2x8x1xf32>
    %27 = vector.broadcast %24 : vector<2x8x1xf32> to vector<2x8x128xf32>
    %28 = arith.subf %20, %27 : vector<2x8x128xf32>
    %29 = math.exp %28 : vector<2x8x128xf32>
    %c0_17 = arith.constant 0 : index
    %c0_18 = arith.constant 0 : index
    %c0_19 = arith.constant 0 : index
    %30 = vector.load %arg8[%c0_17, %c0_18, %c0_19] : memref<2x8x1xf32, #tpu.memory_space<vmem>>, vector<2x8x1xf32>
    %31 = arith.mulf %26, %30 : vector<2x8x1xf32>
    %cst_20 = arith.constant dense<0.000000e+00> : vector<2x8xf32>
    %32 = vector.multi_reduction <add>, %29, %cst_20 [2] : vector<2x8x128xf32> to vector<2x8xf32>
    %33 = vector.shape_cast %32 : vector<2x8xf32> to vector<2x8x1xf32>
    %34 = arith.addf %31, %33 : vector<2x8x1xf32>
    %c0_21 = arith.constant 0 : index
    %c0_22 = arith.constant 0 : index
    %c0_23 = arith.constant 0 : index
    %35 = vector.load %arg8[%c0_21, %c0_22, %c0_23] : memref<2x8x1xf32, #tpu.memory_space<vmem>>, vector<2x8x1xf32>
    tpu.vector_store %arg8[%c0_21, %c0_22, %c0_23], %34 {strides = array<i32>} : memref<2x8x1xf32, #tpu.memory_space<vmem>>, vector<2x8x1xf32>,
    %c0_24 = arith.constant 0 : index
    %c0_25 = arith.constant 0 : index
    %c0_26 = arith.constant 0 : index
    %36 = vector.load %arg9[%c0_24, %c0_25, %c0_26] : memref<2x8x128xf32, #tpu.memory_space<vmem>>, vector<2x8x128xf32>
    %37 = vector.broadcast %26 : vector<2x8x1xf32> to vector<2x8x128xf32>
    %38 = arith.mulf %37, %36 : vector<2x8x128xf32>
    %cst_27 = arith.constant dense<0.000000e+00> : vector<2x8x128xf32>
    %39 = tpu.matmul %29, %5, %cst_27 {dimension_numbers = #tpu.dot_dimension_numbers<[2], [1], [1], [2], [0, 0, 0, 1, 1, 2], [0], [0]>} : vector<2x8x128xf32>, vector<2x128x128xf32>, vector<2x8x128xf32> -> vector<2x8x128xf32>
    %40 = arith.addf %38, %39 : vector<2x8x128xf32>
    %c0_28 = arith.constant 0 : index
    %c0_29 = arith.constant 0 : index
    %c0_30 = arith.constant 0 : index
    %41 = vector.load %arg9[%c0_28, %c0_29, %c0_30] : memref<2x8x128xf32, #tpu.memory_space<vmem>>, vector<2x8x128xf32>
    tpu.vector_store %arg9[%c0_28, %c0_29, %c0_30], %40 {strides = array<i32>} : memref<2x8x128xf32, #tpu.memory_space<vmem>>, vector<2x8x128xf32>,
    %c0_31 = arith.constant 0 : index
    %c0_32 = arith.constant 0 : index
    %c0_33 = arith.constant 0 : index
    %42 = vector.load %arg7[%c0_31, %c0_32, %c0_33] : memref<2x8x1xf32, #tpu.memory_space<vmem>>, vector<2x8x1xf32>
    tpu.vector_store %arg7[%c0_31, %c0_32, %c0_33], %24 {strides = array<i32>} : memref<2x8x1xf32, #tpu.memory_space<vmem>>, vector<2x8x1xf32>,
    %c0_i32_34 = arith.constant 0 : i32
    %43 = arith.cmpi eq, %arg2, %c0_i32_34 : i32
    %44 = arith.extui %43 : i1 to i32
    %c0_i32_35 = arith.constant 0 : i32
    %45 = arith.cmpi ne, %44, %c0_i32_35 : i32
    scf.if %45 {
      %c0_36 = arith.constant 0 : index
      %c0_37 = arith.constant 0 : index
      %c0_38 = arith.constant 0 : index
      %46 = vector.load %arg8[%c0_36, %c0_37, %c0_38] : memref<2x8x1xf32, #tpu.memory_space<vmem>>, vector<2x8x1xf32>
      %47 = tpu.reciprocal %46 {approx = true} : vector<2x8x1xf32> -> vector<2x8x1xf32>
      %48 = arith.mulf %46, %47 : vector<2x8x1xf32>
      %cst_39 = arith.constant 2.000000e+00 : f32
      %49 = vector.broadcast %cst_39 : f32 to vector<2x8x1xf32>
      %50 = arith.subf %49, %48 : vector<2x8x1xf32>
      %51 = arith.mulf %47, %50 : vector<2x8x1xf32>
      %c0_40 = arith.constant 0 : index
      %c0_41 = arith.constant 0 : index
      %c0_42 = arith.constant 0 : index
      %52 = vector.load %arg9[%c0_40, %c0_41, %c0_42] : memref<2x8x128xf32, #tpu.memory_space<vmem>>, vector<2x8x128xf32>
      %53 = vector.broadcast %51 : vector<2x8x1xf32> to vector<2x8x128xf32>
      %54 = arith.mulf %52, %53 : vector<2x8x128xf32>
      %c0_43 = arith.constant 0 : index
      %c0_44 = arith.constant 0 : index
      %c0_45 = arith.constant 0 : index
      %55 = vector.load %arg6[%c0_43, %c0_44, %c0_45] : memref<2x8x128xf32, #tpu.memory_space<vmem>>, vector<2x8x128xf32>
      tpu.vector_store %arg6[%c0_43, %c0_44, %c0_45], %54 {strides = array<i32>} : memref<2x8x128xf32, #tpu.memory_space<vmem>>, vector<2x8x128xf32>,
    } else {
    }
    return
  }
  func.func @transform_0(%arg0: i32, %arg1: i32, %arg2: i32) -> (i32, i32, i32) {
    %c0_i32 = arith.constant 0 : i32
    %c0_i32_0 = arith.constant 0 : i32
    return %arg0, %arg1, %c0_i32 : i32, i32, i32
  }
  func.func @transform_1(%arg0: i32, %arg1: i32, %arg2: i32) -> (i32, i32, i32) {
    %c0_i32 = arith.constant 0 : i32
    %c0_i32_0 = arith.constant 0 : i32
    return %arg0, %arg2, %c0_i32 : i32, i32, i32
  }
  func.func @transform_2(%arg0: i32, %arg1: i32, %arg2: i32) -> (i32, i32, i32) {
    %c0_i32 = arith.constant 0 : i32
    %c0_i32_0 = arith.constant 0 : i32
    return %arg0, %arg2, %c0_i32 : i32, i32, i32
  }
  func.func @transform_3(%arg0: i32, %arg1: i32, %arg2: i32) -> (i32, i32, i32) {
    %c0_i32 = arith.constant 0 : i32
    %c0_i32_0 = arith.constant 0 : i32
    return %arg0, %arg1, %c0_i32 : i32, i32, i32
  }
}

</mosaic_0001>

<bundles_post_ra>
// kernel: tpu_custom_call.1
= control target key start
LH: loop header
LB: loop body
LE: loop exit
PB: predicated region body
PF: predicated region fallthrough
CT: control target
= control target key end

     0   :  { %8 = vsyncpa [#allocation6], 0  ;;  %s1125_s0 = inlined_call_operand.hbm [shape: f32[2,8,128], index: 0, kind: input, shape index: {}]   ;;  %s1126_s1 = inlined_call_operand.hbm [shape: f32[2,128,128], index: 1, kind: input, shape index: {}]   ;;  %s1127_s2 = inlined_call_operand.hbm [shape: f32[2,128,128], index: 2, kind: input, shape index: {}]   ;;  %s1128_s3 = inlined_call_operand.hbm [shape: f32[2,8,128], index: 3, kind: output, shape index: {}]  }
   0x1   :  { %9 = vsyncpa [#allocation9], 0 }
   0x2   :  { %10 = vsyncpa [#allocation7], 0  ;;  %s960_s12 = smov [#allocation8]   ;;  %s961_s14 = smov [#allocation5]  }
   0x3   :  { %s28_s13 = sshll.u32 %s960_s12, 4  ;;  %s16_s15 = sshll.u32 %s961_s14, 4  ;;  %s29_s13 = int_to_ptr.vmem [resolvable:$true] %s28_s13  ;;  %s991_s15 = int_to_ptr.vmem [resolvable:$true] %s16_s15 }
   0x4   :  { %s866_s18 = scalar_lea.hbm %s1126_s1, 4096 }
   0x5   :  { %p867_p0 = scmp.ne.s32.totalorder %s1126_s1, %s866_s18  ;;  %p870_p1 = scmp.lt.u32.totalorder %s866_s18, %s1126_s1 }
   0x7   :  { %p872_p2 = pnand %p870_p1, %p867_p0 }
   0x9   :  { %875 = shalt.err (!%p872_p2)
}
   0xa   :  { %s876_s23 = scalar_lea.vmem %s29_s13, 4096  ;;  %p881_p4 = scmp.lt.s32.totalorder %s29_s13, %s29_s13 }
   0xb   :  { %p877_p3 = scmp.ne.s32.totalorder %s29_s13, %s876_s23  ;;  %p882_p5 = scmp.lt.s32.totalorder %s876_s23, %s876_s23 }
   0xd   :  { %p883_p6 = por %p882_p5, %p881_p4 }
   0xf   :  { %p884_p7 = pnand %p883_p6, %p877_p3 }
  0x11   :  { %887 = shalt.err (!%p884_p7)
}
  0x12   :  { %s962_s24 = smov 128   ;;  %s963_s25 = smov 8  }
  0x13   :  { %34 = dma.hbm_to_vmem [thread:$0]  %s1126_s1, 4096, %s29_s13, [#allocation9], %s962_s24, %s962_s24, %s963_s25  }
  0x14   :  { %s888_s30 = scalar_lea.hbm %s1125_s0, 256 }
  0x15   :  { %p889_p8 = scmp.ne.s32.totalorder %s1125_s0, %s888_s30  ;;  %p892_p9 = scmp.lt.u32.totalorder %s888_s30, %s1125_s0 }
  0x17   :  { %p894_p10 = pnand %p892_p9, %p889_p8 }
  0x19   :  { %897 = shalt.err (!%p894_p10)
}
  0x1a   :  { %s898_s8 = scalar_lea.vmem %s991_s15, 256  ;;  %p903_p12 = scmp.lt.s32.totalorder %s991_s15, %s991_s15 }
  0x1b   :  { %p899_p11 = scmp.ne.s32.totalorder %s991_s15, %s898_s8  ;;  %p904_p13 = scmp.lt.s32.totalorder %s898_s8, %s898_s8 }
  0x1d   :  { %p905_p0 = por %p904_p13, %p903_p12 }
  0x1f   :  { %p906_p1 = pnand %p905_p0, %p899_p11 }
  0x21   :  { %909 = shalt.err (!%p906_p1)
}
  0x22   :  { %22 = dma.hbm_to_vmem [thread:$0]  %s1125_s0, 256, %s991_s15, [#allocation6], %s962_s24, %s962_s24, %s963_s25  }
  0x23   :  { %s964_s10 = smov [#allocation10]   ;;  %s910_s14 = scalar_lea.hbm %s1127_s2, 4096 }
  0x24   :  { %s40_s11 = sshll.u32 %s964_s10, 4  ;;  %p911_p2 = scmp.ne.s32.totalorder %s1127_s2, %s910_s14  ;;  %s41_s11 = int_to_ptr.vmem [resolvable:$true] %s40_s11 }
  0x25   :  { %p914_p3 = scmp.lt.u32.totalorder %s910_s14, %s1127_s2 }
  0x27   :  { %p916_p4 = pnand %p914_p3, %p911_p2 }
  0x29   :  { %919 = shalt.err (!%p916_p4)
}
  0x2a   :  { %s920_s20 = scalar_lea.vmem %s41_s11, 4096  ;;  %p925_p6 = scmp.lt.s32.totalorder %s41_s11, %s41_s11 }
  0x2b   :  { %p921_p5 = scmp.ne.s32.totalorder %s41_s11, %s920_s20  ;;  %p926_p7 = scmp.lt.s32.totalorder %s920_s20, %s920_s20 }
  0x2d   :  { %p927_p8 = por %p926_p7, %p925_p6 }
  0x2f   :  { %p928_p9 = pnand %p927_p8, %p921_p5 }
  0x31   :  { %931 = shalt.err (!%p928_p9)
}
  0x32   :  { %46 = dma.hbm_to_vmem [thread:$0]  %s1127_s2, 4096, %s41_s11, [#allocation9], %s962_s24, %s962_s24, %s963_s25  }
  0x33   :  { %954 = dma.done.wait [#allocation6], 256  }
  0x34   :  { %955 = vsyncadd [#allocation6], 4294967040 }
  0x35   :  { %956 = dma.done.wait [#allocation9], 8192  }
  0x36   :  { %957 = vsyncadd [#allocation9], 4294959104  ;;  %v965_v0 = vmov 0.0|0.0   ;;  %vm966_vm0 = vmmov 0   ;;  %v967_v1 = vmov 0.0   ;;  %v69_v2 = vld [vmem:[#allocation8] sm:$0xff]  ;;  %v280_v53 = vlaneseq }
  0x37   :  { %745 = vmatprep.subr.bf16.mxu0 %v965_v0  ;;  %769 = vmatprep.subr.bf16.mxu1 %v965_v0  ;;  %v70_v3 = vld [vmem:[#allocation8 + $0x8] sm:$0xff]  ;;  %v85_v4 = vld [vmem:[#allocation8 + $0x80] sm:$0xff]  ;;  %v71_v8 = vld [vmem:[#allocation8 + $0x10] sm:$0xff]  ;;  %vm60_vm1 = vcmask 7168   ;;  %v968_v52 = vmov -1e+37  }
  0x38   :  { %637 = vmatprep.mubr.msk.f32.mxu0 %vm966_vm0, %v967_v1  ;;  %672 = vmatprep.mubr.msk.f32.mxu1 %vm966_vm0, %v967_v1  ;;  %v746_v5 = vpack.c.bf16 %v70_v3, %v69_v2  ;;  %v86_v6 = vld [vmem:[#allocation8 + $0x88] sm:$0xff]  ;;  %v72_v9 = vld [vmem:[#allocation8 + $0x18] sm:$0xff]  ;;  %v87_v10 = vld [vmem:[#allocation8 + $0x90] sm:$0xff]  ;;  %61 = vst.msk [vmem:[#allocation2] sm:$0xff] %vm60_vm1, %v968_v52  ;;  %v281_v54 = vand.u32 127, %v280_v53  ;;  %s970_s2 = smov [#allocation11]  }
  0x39   :  { %v770_v7 = vpack.c.bf16 %v86_v6, %v85_v4  ;;  %v88_v11 = vld [vmem:[#allocation8 + $0x98] sm:$0xff]  ;;  %v749_v12 = vpack.c.bf16 %v72_v9, %v71_v8  ;;  %v73_v14 = vld [vmem:[#allocation8 + $0x20] sm:$0xff]  ;;  %v74_v15 = vld [vmem:[#allocation8 + $0x28] sm:$0xff]  ;;  %62 = vst.msk [vmem:[#allocation2 + $0x8] sm:$0xff] %vm60_vm1, %v968_v52  ;;  %s524_s21 = sshll.u32 %s970_s2, 4  ;;  %s525_s21 = int_to_ptr.vmem [resolvable:$true] %s524_s21 }
  0x3a   :  { %747 = vmatpush3.bf16.xpose.msra.mxu0 %v746_v5  ;;  %v773_v13 = vpack.c.bf16 %v88_v11, %v87_v10  ;;  %v89_v16 = vld [vmem:[#allocation8 + $0xa0] sm:$0xff]  ;;  %v90_v17 = vld [vmem:[#allocation8 + $0xa8] sm:$0xff]  ;;  %v752_v18 = vpack.c.bf16 %v74_v15, %v73_v14  ;;  %v75_v20 = vld [vmem:[#allocation8 + $0x30] sm:$0xff]  ;;  %63 = vst.msk [vmem:[#allocation3] sm:$0xff] %vm60_vm1, %v967_v1  ;;  %vm284_vm2 = vcmp.lt.s32.totalorder %v281_v54, 8  ;;  %s932_s22 = scalar_lea.vmem %s525_s21, 256  ;;  %p937_p11 = scmp.lt.s32.totalorder %s525_s21, %s525_s21 }
  0x3b   :  { %771 = vmatpush3.bf16.xpose.msra.mxu1 %v770_v7  ;;  %748 = vmatprep.subr.bf16.mxu0 %v965_v0  ;;  %v776_v19 = vpack.c.bf16 %v90_v17, %v89_v16  ;;  %v76_v21 = vld [vmem:[#allocation8 + $0x38] sm:$0xff]  ;;  %v91_v22 = vld [vmem:[#allocation8 + $0xb0] sm:$0xff]  ;;  %v77_v26 = vld [vmem:[#allocation8 + $0x40] sm:$0xff]  ;;  %64 = vst.msk [vmem:[#allocation3 + $0x8] sm:$0xff] %vm60_vm1, %v967_v1  ;;  %p933_p10 = scmp.ne.s32.totalorder %s525_s21, %s932_s22  ;;  %p938_p12 = scmp.lt.s32.totalorder %s932_s22, %s932_s22 }
  0x3c   :  { %772 = vmatprep.subr.bf16.mxu1 %v965_v0  ;;  %v92_v23 = vld [vmem:[#allocation8 + $0xb8] sm:$0xff]  ;;  %v755_v24 = vpack.c.bf16 %v76_v21, %v75_v20  ;;  %v78_v27 = vld [vmem:[#allocation8 + $0x48] sm:$0xff]  ;;  %v93_v28 = vld [vmem:[#allocation8 + $0xc0] sm:$0xff] }
  0x3d   :  { %v779_v25 = vpack.c.bf16 %v92_v23, %v91_v22  ;;  %v94_v29 = vld [vmem:[#allocation8 + $0xc8] sm:$0xff]  ;;  %v758_v30 = vpack.c.bf16 %v78_v27, %v77_v26  ;;  %v79_v32 = vld [vmem:[#allocation8 + $0x50] sm:$0xff]  ;;  %v80_v33 = vld [vmem:[#allocation8 + $0x58] sm:$0xff]  ;;  %p939_p13 = por %p938_p12, %p937_p11 }
  0x3e   :  { %v782_v31 = vpack.c.bf16 %v94_v29, %v93_v28  ;;  %v95_v34 = vld [vmem:[#allocation8 + $0xd0] sm:$0xff]  ;;  %v96_v35 = vld [vmem:[#allocation8 + $0xd8] sm:$0xff]  ;;  %v761_v36 = vpack.c.bf16 %v80_v33, %v79_v32  ;;  %v81_v38 = vld [vmem:[#allocation8 + $0x60] sm:$0xff] }
  0x3f   :  { %v785_v37 = vpack.c.bf16 %v96_v35, %v95_v34  ;;  %v82_v39 = vld [vmem:[#allocation8 + $0x68] sm:$0xff]  ;;  %v97_v40 = vld [vmem:[#allocation8 + $0xe0] sm:$0xff]  ;;  %v83_v44 = vld [vmem:[#allocation8 + $0x70] sm:$0xff]  ;;  %p940_p0 = pnand %p939_p13, %p933_p10 }
  0x40   :  { %v98_v41 = vld [vmem:[#allocation8 + $0xe8] sm:$0xff]  ;;  %v764_v42 = vpack.c.bf16 %v82_v39, %v81_v38  ;;  %v84_v45 = vld [vmem:[#allocation8 + $0x78] sm:$0xff]  ;;  %v99_v46 = vld [vmem:[#allocation8 + $0xf0] sm:$0xff] }
  0x41   :  { %v788_v43 = vpack.c.bf16 %v98_v41, %v97_v40  ;;  %v100_v47 = vld [vmem:[#allocation8 + $0xf8] sm:$0xff]  ;;  %v767_v48 = vpack.c.bf16 %v84_v45, %v83_v44  ;;  %v67_v50 = vld [vmem:[#allocation5] sm:$0xff]  ;;  %v101_v3 = vld [vmem:[#allocation10] sm:$0xff] }
  0x42   :  { %750 = vmatpush3.bf16.xpose.msra.mxu0 %v749_v12  ;;  %v791_v49 = vpack.c.bf16 %v100_v47, %v99_v46  ;;  %v68_v51 = vld [vmem:[#allocation5 + $0x8] sm:$0xff]  ;;  %v102_v4 = vld [vmem:[#allocation10 + $0x8] sm:$0xff]  ;;  %v103_v5 = vld [vmem:[#allocation10 + $0x10] sm:$0xff] }
  0x43   :  { %774 = vmatpush3.bf16.xpose.msra.mxu1 %v773_v13  ;;  %751 = vmatprep.subr.bf16.mxu0 %v965_v0  ;;  %v794_v6 = vpack.c.bf16 %v102_v4, %v101_v3  ;;  %v104_v7 = vld [vmem:[#allocation10 + $0x18] sm:$0xff]  ;;  %v117_v8 = vld [vmem:[#allocation10 + $0x80] sm:$0xff]  ;;  %v118_v9 = vld [vmem:[#allocation10 + $0x88] sm:$0xff] }
  0x44   :  { %775 = vmatprep.subr.bf16.mxu1 %v965_v0  ;;  %v818_v10 = vpack.c.bf16 %v118_v9, %v117_v8  ;;  %v119_v11 = vld [vmem:[#allocation10 + $0x90] sm:$0xff]  ;;  %v797_v12 = vpack.c.bf16 %v104_v7, %v103_v5  ;;  %v120_v13 = vld [vmem:[#allocation10 + $0x98] sm:$0xff]  ;;  %v105_v14 = vld [vmem:[#allocation10 + $0x20] sm:$0xff] }
  0x45   :  { %v106_v15 = vld [vmem:[#allocation10 + $0x28] sm:$0xff]  ;;  %v821_v16 = vpack.c.bf16 %v120_v13, %v119_v11  ;;  %v121_v17 = vld [vmem:[#allocation10 + $0xa0] sm:$0xff]  ;;  %v107_v20 = vld [vmem:[#allocation10 + $0x30] sm:$0xff] }
  0x46   :  { %v108_v21 = vld [vmem:[#allocation10 + $0x38] sm:$0xff]  ;;  %v109_v26 = vld [vmem:[#allocation10 + $0x40] sm:$0xff]  ;;  %v110_v27 = vld [vmem:[#allocation10 + $0x48] sm:$0xff] }
  0x47   :  { %v803_v23 = vpack.c.bf16 %v108_v21, %v107_v20  ;;  %v123_v28 = vld [vmem:[#allocation10 + $0xb0] sm:$0xff]  ;;  %v288_v32 = vld [vmem:[#allocation2 + $0x8] sm:$0xff]  ;;  %v125_v38 = vld [vmem:[#allocation10 + $0xc0] sm:$0xff] }
  0x48   :  { %v126_v41 = vld [vmem:[#allocation10 + $0xc8] sm:$0xff]  ;;  %v113_v44 = vld [vmem:[#allocation10 + $0x60] sm:$0xff]  ;;  %v127_v46 = vld [vmem:[#allocation10 + $0xd0] sm:$0xff] }
  0x49   :  { %v114_v45 = vld [vmem:[#allocation10 + $0x68] sm:$0xff]  ;;  %v129_v52 = vld [vmem:[#allocation10 + $0xe0] sm:$0xff] }
  0x4a   :  { %753 = vmatpush3.bf16.xpose.msra.mxu0 %v752_v18  ;;  %v122_v18 = vld [vmem:[#allocation10 + $0xa8] sm:$0xff]  ;;  %v812_v47 = vpack.c.bf16 %v114_v45, %v113_v44 }
  0x4b   :  { %777 = vmatpush3.bf16.xpose.msra.mxu1 %v776_v19  ;;  %754 = vmatprep.subr.bf16.mxu0 %v965_v0  ;;  %v800_v19 = vpack.c.bf16 %v106_v15, %v105_v14  ;;  %v824_v22 = vpack.c.bf16 %v122_v18, %v121_v17  ;;  %v130_v54 = vld [vmem:[#allocation10 + $0xe8] sm:$0xff] }
  0x4c   :  { %778 = vmatprep.subr.bf16.mxu1 %v965_v0 }
  0x52   :  { %756 = vmatpush3.bf16.xpose.msra.mxu0 %v755_v24  ;;  %v1088_v24 = vld [vmem:[#allocation2] sm:$0xff] }
  0x53   :  { %780 = vmatpush3.bf16.xpose.msra.mxu1 %v779_v25  ;;  %757 = vmatprep.subr.bf16.mxu0 %v965_v0 }
  0x54   :  { %781 = vmatprep.subr.bf16.mxu1 %v965_v0 }
  0x5a   :  { %759 = vmatpush3.bf16.xpose.msra.mxu0 %v758_v30  ;;  %v806_v30 = vpack.c.bf16 %v110_v27, %v109_v26 }
  0x5b   :  { %783 = vmatpush3.bf16.xpose.msra.mxu1 %v782_v31  ;;  %760 = vmatprep.subr.bf16.mxu0 %v965_v0  ;;  %v124_v31 = vld [vmem:[#allocation10 + $0xb8] sm:$0xff] }
  0x5c   :  { %784 = vmatprep.subr.bf16.mxu1 %v965_v0  ;;  %v827_v33 = vpack.c.bf16 %v124_v31, %v123_v28 }
  0x62   :  { %762 = vmatpush3.bf16.xpose.msra.mxu0 %v761_v36  ;;  %v111_v36 = vld [vmem:[#allocation10 + $0x50] sm:$0xff] }
  0x63   :  { %786 = vmatpush3.bf16.xpose.msra.mxu1 %v785_v37  ;;  %763 = vmatprep.subr.bf16.mxu0 %v965_v0  ;;  %v112_v37 = vld [vmem:[#allocation10 + $0x58] sm:$0xff] }
  0x64   :  { %787 = vmatprep.subr.bf16.mxu1 %v965_v0  ;;  %v809_v40 = vpack.c.bf16 %v112_v37, %v111_v36 }
  0x6a   :  { %765 = vmatpush3.bf16.xpose.msra.mxu0 %v764_v42  ;;  %v830_v42 = vpack.c.bf16 %v126_v41, %v125_v38 }
  0x6b   :  { %789 = vmatpush3.bf16.xpose.msra.mxu1 %v788_v43  ;;  %766 = vmatprep.subr.bf16.mxu0 %v965_v0 }
  0x6c   :  { %790 = vmatprep.subr.bf16.mxu1 %v965_v0 }
  0x72   :  { %768 = vmatpush3.bf16.xpose.msra.mxu0 %v767_v48  ;;  %v128_v48 = vld [vmem:[#allocation10 + $0xd8] sm:$0xff] }
  0x73   :  { %792 = vmatpush3.bf16.xpose.msra.mxu1 %v791_v49  ;;  %793 = vmatprep.subr.bf16.mxu0 %v965_v0  ;;  %v833_v49 = vpack.c.bf16 %v128_v48, %v127_v46 }
  0x74   :  { %817 = vmatprep.subr.bf16.mxu1 %v965_v0 }
  0x79   :  { %638 = vmatmul.mubr.f32.vlgmr.msra.gmra.mrb[0].mxu0 %v67_v50  ;;  %v115_v50 = vld [vmem:[#allocation10 + $0x70] sm:$0xff] }
  0x7a   :  { %673 = vmatmul.mubr.f32.vlgmr.msra.gmra.mrb[0].mxu1 %v68_v51  ;;  %707 = vmatprep.mubr.msk.f32.mxu0 %vm966_vm0, %v967_v1  ;;  %v116_v51 = vld [vmem:[#allocation10 + $0x78] sm:$0xff] }
  0x7b   :  { %742 = vmatprep.mubr.msk.f32.mxu1 %vm966_vm0, %v967_v1  ;;  %v969_v1 = vmov 0   ;;  %795 = vmatpush3.bf16.msra.mxu0 %v794_v6  ;;  %v815_v53 = vpack.c.bf16 %v116_v51, %v115_v50 }
  0x7c   :  { %852 = vset.pattern.permute.xlu1 %v969_v1  ;;  %853 = vset.pattern.permute.xlu0 %v969_v1 }
  0x7d   :  { %796 = vmatprep.subr.bf16.mxu0 %v965_v0  ;;  %819 = vmatpush3.bf16.msra.mxu1 %v818_v10 }
  0x7e   :  { %820 = vmatprep.subr.bf16.mxu1 %v965_v0 }
  0x7f   :  { %798 = vmatpush3.bf16.msra.mxu0 %v797_v12 }
  0x80   :  { %799 = vmatprep.subr.bf16.mxu0 %v965_v0 }
  0x81   :  { %822 = vmatpush3.bf16.msra.mxu1 %v821_v16 }
  0x82   :  { %823 = vmatprep.subr.bf16.mxu1 %v965_v0 }
  0x83   :  { %801 = vmatpush3.bf16.msra.mxu0 %v800_v19 }
  0x84   :  { %802 = vmatprep.subr.bf16.mxu0 %v965_v0 }
  0x85   :  { %825 = vmatpush3.bf16.msra.mxu1 %v824_v22 }
  0x86   :  { %826 = vmatprep.subr.bf16.mxu1 %v965_v0 }
  0x87   :  { %804 = vmatpush3.bf16.msra.mxu0 %v803_v23 }
  0x88   :  { %805 = vmatprep.subr.bf16.mxu0 %v965_v0 }
  0x89   :  { %828 = vmatpush3.bf16.msra.mxu1 %v827_v33 }
  0x8a   :  { %829 = vmatprep.subr.bf16.mxu1 %v965_v0 }
  0x8b   :  { %807 = vmatpush3.bf16.msra.mxu0 %v806_v30 }
  0x8c   :  { %808 = vmatprep.subr.bf16.mxu0 %v965_v0 }
  0x8d   :  { %831 = vmatpush3.bf16.msra.mxu1 %v830_v42 }
  0x8e   :  { %832 = vmatprep.subr.bf16.mxu1 %v965_v0 }
  0x8f   :  { %810 = vmatpush3.bf16.msra.mxu0 %v809_v40 }
  0x90   :  { %811 = vmatprep.subr.bf16.mxu0 %v965_v0 }
  0x91   :  { %834 = vmatpush3.bf16.msra.mxu1 %v833_v49 }
  0x92   :  { %835 = vmatprep.subr.bf16.mxu1 %v965_v0 }
  0x93   :  { %813 = vmatpush3.bf16.msra.mxu0 %v812_v47 }
  0x94   :  { %814 = vmatprep.subr.bf16.mxu0 %v965_v0 }
  0x97   :  { %816 = vmatpush3.bf16.msra.mxu0 %v815_v53 }
 0x14c   :  { %v199_v55 = vpop.f32.mrb[0].mxu0 }
 0x14d   :  { %v273_v56 = vmul.f32 0.17677669, %v199_v55  ;;  %v639_v57 = vpop.f32.mrb[1].mxu0  ;;  %v269_v58 = vpop.f32.mrb[0].mxu1  ;;  %v836_v55 = vpack.c.bf16 %v130_v54, %v129_v52 }
 0x14e   :  { %v274_v59 = vmul.f32 0.17677669, %v269_v58  ;;  %v674_v60 = vpop.f32.mrb[1].mxu1  ;;  %v132_v57 = vld [vmem:[#allocation10 + $0xf8] sm:$0xff] }
 0x14f   :  { %vm275_vm3 = vcmp.eq.f32.partialorder %v273_v56, 0.0  ;;  %837 = vmatpush3.bf16.msra.mxu1 %v836_v55 }
 0x150   :  { %v277_v61 = vsel %vm275_vm3, -1e+30, %v273_v56  ;;  %vm276_vm4 = vcmp.eq.f32.partialorder %v274_v59, 0.0  ;;  %v131_v56 = vld [vmem:[#allocation10 + $0xf0] sm:$0xff]  ;;  %838 = vmatprep.subr.bf16.mxu1 %v965_v0 }
 0x151   :  { %v1075_v62 = vsel %vm284_vm2, %v277_v61, -1e+37  ;;  %v278_v63 = vsel %vm276_vm4, -1e+30, %v274_v59  ;;  %v839_v58 = vpack.c.bf16 %v132_v57, %v131_v56 }
 0x152   :  { %289 = vmax.xlane.f32.xlu0 %v1075_v62  ;;  %v1078_v2 = vsel %vm284_vm2, %v278_v63, -1e+37 }
 0x153   :  { %840 = vmatpush3.bf16.msra.mxu1 %v839_v58 }
 0x156   :  { %291 = vmax.xlane.f32.xlu0 %v1078_v2 }
 0x1df   :  { %v290_v25 = vpop.xlane.xlu0 %289 }
 0x1e0   :  { %v1091_v29 = vmax.f32 %v1088_v24, %v290_v25 }
 0x1e2   :  { %v295_v34 = vsub.f32 %v1088_v24, %v1091_v29  ;;  %488 = vst.msk [vmem:[#allocation2] sm:$0xff] %vm60_vm1, %v1091_v29  ;;  %303 = vperm.xlu1 %852, %v1091_v29  }
 0x1e3   :  { %v292_v35 = vpop.xlane.xlu0 %291 }
 0x1e4   :  { %v294_v39 = vmax.f32 %v288_v32, %v292_v35  ;;  %v297_v0 = vmul.f32 1.442695, %v295_v34 }
 0x1e6   :  { %v296_v43 = vsub.f32 %v288_v32, %v294_v39  ;;  %489 = vst.msk [vmem:[#allocation2 + $0x8] sm:$0xff] %vm60_vm1, %v294_v39  ;;  %308 = vperm.xlu1 %852, %v294_v39  }
 0x1e8   :  { %v299_v6 = vmul.f32 1.442695, %v296_v43 }
 0x261   :  { %v304_v59 = vpop.permute.xlu1 %303 }
 0x262   :  { %v311_v60 = vsub.f32 %v1075_v62, %v304_v59  ;;  %v317_v62 = vld [vmem:[#allocation3] sm:$0xff] }
 0x264   :  { %v313_v61 = vmul.f32 1.442695, %v311_v60 }
 0x265   :  { %v309_v63 = vpop.permute.xlu1 %308 }
 0x266   :  { %854 = vpow2.f32 %v313_v61  ;;  %v312_v1 = vsub.f32 %v1078_v2, %v309_v63  ;;  %v318_v2 = vld [vmem:[#allocation3 + $0x8] sm:$0xff] }
 0x268   :  { %v315_v3 = vmul.f32 1.442695, %v312_v1 }
 0x26a   :  { %856 = vpow2.f32 %v315_v3 }
 0x26b   :  { %858 = vpow2.f32 %v299_v6 }
 0x26c   :  { %860 = vpow2.f32 %v297_v0 }
 0x270   :  { %v855_v4 = vpop.eup %854 }
 0x271   :  { %321 = vadd.xlane.f32.xlu0 %v855_v4  ;;  %708 = vmatmul.mubr.f32.vlgmr.msra.gmra.mrb[2].mxu0 %v855_v4 }
 0x274   :  { %v857_v5 = vpop.eup %856 }
 0x275   :  { %323 = vadd.xlane.f32.xlu1 %v857_v5  ;;  %743 = vmatmul.mubr.f32.vlgmr.msra.gmra.mrb[2].mxu1 %v857_v5  ;;  %v859_v7 = vpop.eup %858 }
 0x276   :  { %v861_v8 = vpop.eup %860  ;;  %v320_v12 = vmul.f32 %v859_v7, %v318_v2 }
 0x277   :  { %v319_v9 = vmul.f32 %v861_v8, %v317_v62 }
 0x286   :  { %339 = vperm.xlu1 %852, %v859_v7  }
 0x287   :  { %334 = vperm.xlu0 %853, %v861_v8  }
 0x2fe   :  { %v322_v10 = vpop.xlane.xlu0 %321 }
 0x2ff   :  { %v325_v11 = vadd.f32 %v322_v10, %v319_v9 }
 0x301   :  { %328 = vst.msk [vmem:[#allocation3] sm:$0xff] %vm60_vm1, %v325_v11 }
 0x302   :  { %v324_v13 = vpop.xlane.xlu1 %323 }
 0x303   :  { %v326_v14 = vadd.f32 %v324_v13, %v320_v12 }
 0x305   :  { %329 = vst.msk [vmem:[#allocation3 + $0x8] sm:$0xff] %vm60_vm1, %v326_v14 }
 0x306   :  { %v335_v29 = vpop.permute.xlu0 %334  ;;  %v340_v31 = vpop.permute.xlu1 %339 }
 0x307   :  { %v342_v30 = vmul.f32 0.0, %v335_v29  ;;  %v343_v34 = vmul.f32 0.0, %v340_v31 }
 0x308   :  { %v493_v15 = vld [vmem:[#allocation3] sm:$0xff] }
 0x309   :  { %862 = vrcp.f32 %v493_v15 }
 0x30c   :  { %v494_v16 = vld [vmem:[#allocation3 + $0x8] sm:$0xff] }
 0x30d   :  { %864 = vrcp.f32 %v494_v16 }
 0x313   :  { %v863_v17 = vpop.eup %862 }
 0x314   :  { %v497_v18 = vmul.f32 %v863_v17, %v493_v15 }
 0x316   :  { %v499_v19 = vsub.f32 2.0, %v497_v18 }
 0x317   :  { %v865_v20 = vpop.eup %864 }
 0x318   :  { %v501_v21 = vmul.f32 %v863_v17, %v499_v19  ;;  %v498_v22 = vmul.f32 %v865_v20, %v494_v16 }
 0x31a   :  { %507 = vperm.xlu0 %853, %v501_v21   ;;  %v500_v23 = vsub.f32 2.0, %v498_v22 }
 0x31c   :  { %v502_v24 = vmul.f32 %v865_v20, %v500_v23 }
 0x31e   :  { %512 = vperm.xlu0 %853, %v502_v24  }
 0x344   :  { %v410_v25 = vpop.f32.mrb[2].mxu0 }
 0x345   :  { %v709_v26 = vpop.f32.mrb[3].mxu0  ;;  %v484_v32 = vadd.f32 %v410_v25, %v342_v30 }
 0x348   :  { %v480_v27 = vpop.f32.mrb[2].mxu1 }
 0x349   :  { %v744_v28 = vpop.f32.mrb[3].mxu1  ;;  %v485_v36 = vadd.f32 %v480_v27, %v343_v34 }
 0x399   :  { %v508_v33 = vpop.permute.xlu0 %507 }
 0x39a   :  { %v515_v35 = vmul.f32 %v508_v33, %v484_v32 }
 0x39c   :  { %517 = vst [vmem:[#allocation11] sm:$0xff] %v515_v35 }
 0x39d   :  { %v513_v37 = vpop.permute.xlu0 %512 }
 0x39e   :  { %v516_v38 = vmul.f32 %v513_v37, %v485_v36 }
 0x3a0   :  { %518 = vst [vmem:[#allocation11 + $0x8] sm:$0xff] %v516_v38 }
 0x3a1   :  { %943 = shalt.err (!%p940_p0)
}
 0x3a2   :  { %s944_s27 = scalar_lea.hbm %s1128_s3, 256 }
 0x3a3   :  { %p945_p1 = scmp.ne.s32.totalorder %s1128_s3, %s944_s27  ;;  %p948_p2 = scmp.lt.u32.totalorder %s944_s27, %s1128_s3 }
 0x3a5   :  { %p950_p3 = pnand %p948_p2, %p945_p1 }
 0x3a7   :  { %953 = shalt.err (!%p950_p3)
}
 0x3a8   :  { %530 = dma.vmem_to_hbm [thread:$0]  %s525_s21, 256, %s1128_s3, [#allocation7], %s962_s24, %s962_s24, %s963_s25  }
 0x3a9   :  { %958 = dma.done.wait [#allocation7], 256  }
 0x3aa   :  { %959 = vsyncadd [#allocation7], 4294967040 }
 0x3ab   :  { %534 = vsyncpa [#allocation6], 1 }
 0x3ac   :  { %535 = vsyncpa [#allocation9], 1 }
 0x3ad   :  { %536 = vsyncpa [#allocation7], 1 }

</bundles_post_ra>
